<compile_context>
chip_gen: v5e
topology: v5e:2x2
jax: 0.10.0
libtpu: 0.0.40
codegen_flags: <defaults>
</compile_context>

<pallas_src>
import jax
import jax.numpy as jnp
from jax.experimental import pallas as pl
from jax.experimental.pallas import tpu as pltpu

LANE = 128  # lane width (last-dim granularity)


def _round_up(n, m):
    return (n + m - 1) // m * m


def _cdiv(a, b):
    return (a + b - 1) // b


def _pad2d(a, rows, cols, dtype=jnp.float32):
    """Zero-pad a 2-D array to (rows, cols) and cast to dtype."""
    out = jnp.zeros((rows, cols), dtype)
    return out.at[: a.shape[0], : a.shape[1]].set(a.astype(dtype))


def prepare_params(w1, b1, w2, b2):
    """One-time (init) parameter padding — NOT done per forward call.

    * W1 keeps its K dim (= input_size) unpadded; its hidden (lane) dim is
      zero-padded to a multiple of 128.
    * W2's K dim is zero-padded to the padded hidden size (those rows multiply
      exactly-zero hidden lanes); its output dim stays narrow (= out_f).
    * Biases are stored as (1, features); b1 is lane-padded to the hidden pad.
    Weights are stored pre-transposed as (in, out).
    """
    in_f, hid = w1.shape
    hid2, out_f = w2.shape
    assert hid2 == hid
    hid_p = _round_up(hid, LANE)
    w1_p = _pad2d(w1, in_f, hid_p)
    b1_p = _pad2d(jnp.reshape(b1, (1, -1)), 1, hid_p)
    w2_p = _pad2d(w2, hid_p, out_f)
    b2_p = jnp.reshape(b2, (1, -1)).astype(jnp.float32)
    return w1_p, b1_p, w2_p, b2_p


def dql_kernel(x_ref, w1_ref, b1_ref, w2_ref, b2_ref, o_ref):
    # fc1 + ReLU.  K = input_size (unpadded; Mosaic pads the short contraction
    # internally).  f32 MXU accumulate, f32 VPU elementwise.
    h = jnp.dot(x_ref[...], w1_ref[...], preferred_element_type=jnp.float32)
    h = jnp.maximum(h + b1_ref[...], 0.0)
    # fc2.  Hidden lanes beyond the real hidden size are exactly zero (zero W1
    # columns + zero b1 lanes), and the matching W2 rows are zero as well, so
    # the padded lanes contribute nothing.
    q = jnp.dot(h, w2_ref[...], preferred_element_type=jnp.float32)
    o_ref[...] = q + b2_ref[...]


def _choose_block_b(batch):
    """Batch tile: multiple of 16, large enough to amortize per-step overhead,
    and >= 2 tiles for big batches so v7x's two TensorCores both get work."""
    b16 = _round_up(max(batch, 1), 16)
    if b16 <= 256:
        return b16  # single tile; splitting buys nothing at this size
    n_tiles = max(2, _cdiv(b16, 1024))  # ~1024-row tiles, at least 2 of them
    return _round_up(_cdiv(b16, n_tiles), 16)


def dql_forward(x, w1_p, b1_p, w2_p, b2_p, *, block_b=None):
    """y = ReLU(x @ W1 + b1) @ W2 + b2, with params pre-padded by prepare_params."""
    x = x.astype(jnp.float32)
    B, in_f = x.shape
    hid_p = w1_p.shape[1]
    out_f = w2_p.shape[1]

    if block_b is None:
        block_b = _choose_block_b(B)
    b_p = _round_up(B, block_b)
    if b_p != B:
        # Only the batch (sublane) dim is padded; lanes stay at in_f.
        x = jnp.pad(x, ((0, b_p - B), (0, 0)))

    grid = (b_p // block_b,)

    out = pl.pallas_call(
        dql_kernel,
        out_shape=jax.ShapeDtypeStruct((b_p, out_f), jnp.float32),
        grid=grid,
        in_specs=[
            pl.BlockSpec((block_b, in_f), lambda i: (i, 0)),   # x: batch-tiled
            pl.BlockSpec((in_f, hid_p), lambda i: (0, 0)),     # W1: resident
            pl.BlockSpec((1, hid_p), lambda i: (0, 0)),        # b1: resident
            pl.BlockSpec((hid_p, out_f), lambda i: (0, 0)),    # W2: resident
            pl.BlockSpec((1, out_f), lambda i: (0, 0)),        # b2: resident
        ],
        out_specs=pl.BlockSpec((block_b, out_f), lambda i: (i, 0)),
        compiler_params=pltpu.CompilerParams(
            dimension_semantics=("parallel",)),
    )(x, w1_p, b1_p, w2_p, b2_p)

    # Padded batch rows compute relu(b1) @ W2 + b2 garbage; slice them off.
    return out[:B]


def init_linear(key, fan_in, fan_out):
    """PyTorch nn.Linear default init: U(-1/sqrt(fan_in), 1/sqrt(fan_in)).
    Weight returned pre-transposed as (fan_in, fan_out); bias as (fan_out,)."""
    k_w, k_b = jax.random.split(key)
    bound = 1.0 / jnp.sqrt(float(fan_in))
    w = jax.random.uniform(k_w, (fan_in, fan_out), jnp.float32, -bound, bound)
    b = jax.random.uniform(k_b, (fan_out,), jnp.float32, -bound, bound)
    return w, b


def reference_forward(x, w1, b1, w2, b2):
    """Full-precision plain-JAX reference of the PyTorch forward."""
    h = jnp.maximum(
        jnp.dot(x, w1, precision=jax.lax.Precision.HIGHEST) + b1, 0.0)
    return jnp.dot(h, w2, precision=jax.lax.Precision.HIGHEST) + b2


if __name__ == "__main__":
    input_size, hidden_size, output_size = 16, 32, 8
    batch = 4

    key = jax.random.PRNGKey(0)
    k_x, k_fc1, k_fc2 = jax.random.split(key, 3)

    x = jax.random.normal(k_x, (batch, input_size), jnp.float32)
    w1, b1 = init_linear(k_fc1, input_size, hidden_size)
    w2, b2 = init_linear(k_fc2, hidden_size, output_size)

    # One-time parameter padding at "init" — reused across every forward call.
    params_p = prepare_params(w1, b1, w2, b2)

    fwd = jax.jit(dql_forward)
    out = jax.block_until_ready(fwd(x, *params_p))
    assert out.shape == (batch, output_size)

    ref = reference_forward(x, w1, b1, w2, b2)
    max_err = jnp.max(jnp.abs(out - ref))
    assert jnp.allclose(out, ref, atol=1e-3, rtol=1e-3), \
        f"mismatch vs f32 reference (max abs err {max_err})"

    print("KERNEL_OK")
</pallas_src>

<mosaic_0001>
module attributes {stable_mosaic.version = 11 : i64} {
  func.func @dql_kernel(%arg0: i32, %arg1: memref<16x16xf32, #tpu.memory_space<vmem>>, %arg2: memref<16x128xf32, #tpu.memory_space<vmem>>, %arg3: memref<1x128xf32, #tpu.memory_space<vmem>>, %arg4: memref<128x8xf32, #tpu.memory_space<vmem>>, %arg5: memref<1x8xf32, #tpu.memory_space<vmem>>, %arg6: memref<16x8xf32, #tpu.memory_space<vmem>>) attributes {dimension_semantics = [#tpu.dimension_semantics<parallel>], iteration_bounds = array<i64: 1>, scalar_prefetch = 0 : i64, scratch_operands = 0 : i64, tpu.core_type = #tpu.core_type<tc>, window_params = [{transform_indices = @transform_0, window_bounds = array<i64: 16, 16>}, {pipeline_mode = #tpu.pipeline_mode<synchronous>, transform_indices = @transform_1, window_bounds = array<i64: 16, 128>}, {pipeline_mode = #tpu.pipeline_mode<synchronous>, transform_indices = @transform_2, window_bounds = array<i64: 1, 128>}, {pipeline_mode = #tpu.pipeline_mode<synchronous>, transform_indices = @transform_3, window_bounds = array<i64: 128, 8>}, {pipeline_mode = #tpu.pipeline_mode<synchronous>, transform_indices = @transform_4, window_bounds = array<i64: 1, 8>}, {transform_indices = @transform_5, window_bounds = array<i64: 16, 8>}]} {
    %c0 = arith.constant 0 : index
    %c0_0 = arith.constant 0 : index
    %0 = vector.load %arg1[%c0, %c0_0] : memref<16x16xf32, #tpu.memory_space<vmem>>, vector<16x16xf32>
    %c0_1 = arith.constant 0 : index
    %c0_2 = arith.constant 0 : index
    %1 = vector.load %arg2[%c0_1, %c0_2] : memref<16x128xf32, #tpu.memory_space<vmem>>, vector<16x128xf32>
    %cst = arith.constant dense<0.000000e+00> : vector<16x128xf32>
    %2 = tpu.matmul %0, %1, %cst {dimension_numbers = #tpu.dot_dimension_numbers<[1], [0], [0], [1], [0, 0, 1, 1], [], []>} : vector<16x16xf32>, vector<16x128xf32>, vector<16x128xf32> -> vector<16x128xf32>
    %c0_3 = arith.constant 0 : index
    %c0_4 = arith.constant 0 : index
    %3 = vector.load %arg3[%c0_3, %c0_4] : memref<1x128xf32, #tpu.memory_space<vmem>>, vector<1x128xf32>
    %4 = vector.broadcast %3 : vector<1x128xf32> to vector<16x128xf32>
    %5 = arith.addf %2, %4 : vector<16x128xf32>
    %cst_5 = arith.constant 0.000000e+00 : f32
    %6 = vector.broadcast %cst_5 : f32 to vector<16x128xf32>
    %7 = arith.maximumf %5, %6 : vector<16x128xf32>
    %c0_6 = arith.constant 0 : index
    %c0_7 = arith.constant 0 : index
    %8 = vector.load %arg4[%c0_6, %c0_7] : memref<128x8xf32, #tpu.memory_space<vmem>>, vector<128x8xf32>
    %cst_8 = arith.constant dense<0.000000e+00> : vector<16x8xf32>
    %9 = tpu.matmul %7, %8, %cst_8 {dimension_numbers = #tpu.dot_dimension_numbers<[1], [0], [0], [1], [0, 0, 1, 1], [], []>} : vector<16x128xf32>, vector<128x8xf32>, vector<16x8xf32> -> vector<16x8xf32>
    %c0_9 = arith.constant 0 : index
    %c0_10 = arith.constant 0 : index
    %10 = vector.load %arg5[%c0_9, %c0_10] : memref<1x8xf32, #tpu.memory_space<vmem>>, vector<1x8xf32>
    %11 = vector.broadcast %10 : vector<1x8xf32> to vector<16x8xf32>
    %12 = arith.addf %9, %11 : vector<16x8xf32>
    %c0_11 = arith.constant 0 : index
    %c0_12 = arith.constant 0 : index
    %13 = vector.load %arg6[%c0_11, %c0_12] : memref<16x8xf32, #tpu.memory_space<vmem>>, vector<16x8xf32>
    tpu.vector_store %arg6[%c0_11, %c0_12], %12 {strides = array<i32>} : memref<16x8xf32, #tpu.memory_space<vmem>>, vector<16x8xf32>,
    return
  }
  func.func @transform_0(%arg0: i32) -> (i32, i32) {
    %c0_i32 = arith.constant 0 : i32
    %c0_i32_0 = arith.constant 0 : i32
    return %arg0, %c0_i32 : i32, i32
  }
  func.func @transform_1(%arg0: i32) -> (i32, i32) {
    %c0_i32 = arith.constant 0 : i32
    %c0_i32_0 = arith.constant 0 : i32
    %c0_i32_1 = arith.constant 0 : i32
    return %c0_i32, %c0_i32_0 : i32, i32
  }
  func.func @transform_2(%arg0: i32) -> (i32, i32) {
    %c0_i32 = arith.constant 0 : i32
    %c0_i32_0 = arith.constant 0 : i32
    %c0_i32_1 = arith.constant 0 : i32
    return %c0_i32, %c0_i32_0 : i32, i32
  }
  func.func @transform_3(%arg0: i32) -> (i32, i32) {
    %c0_i32 = arith.constant 0 : i32
    %c0_i32_0 = arith.constant 0 : i32
    %c0_i32_1 = arith.constant 0 : i32
    return %c0_i32, %c0_i32_0 : i32, i32
  }
  func.func @transform_4(%arg0: i32) -> (i32, i32) {
    %c0_i32 = arith.constant 0 : i32
    %c0_i32_0 = arith.constant 0 : i32
    %c0_i32_1 = arith.constant 0 : i32
    return %c0_i32, %c0_i32_0 : i32, i32
  }
  func.func @transform_5(%arg0: i32) -> (i32, i32) {
    %c0_i32 = arith.constant 0 : i32
    %c0_i32_0 = arith.constant 0 : i32
    return %arg0, %c0_i32 : i32, i32
  }
}

</mosaic_0001>

<bundles_post_ra>
// kernel: dql_forward.1
= control target key start
LH: loop header
LB: loop body
LE: loop exit
PB: predicated region body
PF: predicated region fallthrough
CT: control target
= control target key end

     0   :  { %vm28_vm0 = vcmask 130048   ;;  %vm103_vm1 = vcmask 64512   ;;  %s234_s1 = inlined_call_operand.vmem [shape: f32[16,128], index: 1, kind: input, shape index: {}]   ;;  %s235_s0 = inlined_call_operand.vmem [shape: f32[16,16], index: 0, kind: input, shape index: {}]   ;;  %s236_s3 = inlined_call_operand.vmem [shape: f32[128,8], index: 3, kind: input, shape index: {}]   ;;  %s237_s2 = inlined_call_operand.vmem [shape: f32[1,128], index: 2, kind: input, shape index: {}]   ;;  %s238_s4 = inlined_call_operand.vmem [shape: f32[1,8], index: 4, kind: input, shape index: {}]   ;;  %s239_s5 = inlined_call_operand.vmem [shape: f32[16,8], index: 5, kind: output, shape index: {}]  }
   0x1   :  { %v23_v0 = vld [vmem:[%s234_s1 + $0x8] sm:$0xff]  ;;  %v22_v1 = vld [vmem:[%s234_s1] sm:$0xff]  ;;  %v75_v3 = vld [vmem:[%s236_s3 + $0x78] sm:$0xff] }
   0x2   :  { %49 = vmatpush.msra.mxu0 %v23_v0  ;;  %v20_v2 = vld [vmem:[%s235_s0] sm:$0xff]  ;;  %v74_v4 = vld [vmem:[%s236_s3 + $0x70] sm:$0xff]  ;;  %80 = vmatpush.msra.mxu1 %v75_v3  ;;  %v73_v5 = vld [vmem:[%s236_s3 + $0x68] sm:$0xff] }
   0x3   :  { %112 = vmatpush.msra.mxu2 %v75_v3  ;;  %v72_v6 = vld [vmem:[%s236_s3 + $0x60] sm:$0xff]  ;;  %v71_v7 = vld [vmem:[%s236_s3 + $0x58] sm:$0xff]  ;;  %v21_v8 = vld [vmem:[%s235_s0 + $0x8] sm:$0xff] }
   0x4   :  { %50 = vmatpush.msra.mxu0 %v22_v1  ;;  %81 = vmatpush.msra.mxu1 %v74_v4  ;;  %v70_v9 = vld [vmem:[%s236_s3 + $0x50] sm:$0xff]  ;;  %v69_v10 = vld [vmem:[%s236_s3 + $0x48] sm:$0xff]  ;;  %v68_v11 = vld [vmem:[%s236_s3 + $0x40] sm:$0xff] }
   0x5   :  { %110 = vmatmul.msk.f32.vlgmr.msra.gmra.mxu0 %vm28_vm0, %v20_v2  ;;  %113 = vmatpush.msra.mxu2 %v74_v4  ;;  %v67_v12 = vld [vmem:[%s236_s3 + $0x38] sm:$0xff]  ;;  %v66_v13 = vld [vmem:[%s236_s3 + $0x30] sm:$0xff]  ;;  %v65_v14 = vld [vmem:[%s236_s3 + $0x28] sm:$0xff] }
   0x6   :  { %82 = vmatpush.msra.mxu1 %v73_v5  ;;  %v64_v15 = vld [vmem:[%s236_s3 + $0x20] sm:$0xff]  ;;  %v63_v16 = vld [vmem:[%s236_s3 + $0x18] sm:$0xff]  ;;  %v62_v17 = vld [vmem:[%s236_s3 + $0x10] sm:$0xff] }
   0x7   :  { %114 = vmatpush.msra.mxu2 %v73_v5  ;;  %v61_v18 = vld [vmem:[%s236_s3 + $0x8] sm:$0xff]  ;;  %v60_v19 = vld [vmem:[%s236_s3] sm:$0xff] }
   0x8   :  { %83 = vmatpush.msra.mxu1 %v72_v6  ;;  %v128_v20 = vld [vmem:[%s237_s2] ss:$0 sm:$0xff] }
   0x9   :  { %115 = vmatpush.msra.mxu2 %v72_v6  ;;  %v129_v27 = vld [vmem:[%s238_s4] ss:$0 sm:$0xff] }
   0xa   :  { %84 = vmatpush.msra.mxu1 %v71_v7 }
   0xb   :  { %116 = vmatpush.msra.mxu2 %v71_v7 }
   0xc   :  { %85 = vmatpush.msra.mxu1 %v70_v9 }
   0xd   :  { %111 = vmatmul.msk.f32.gmra.mxu0 %vm28_vm0, %v21_v8  ;;  %117 = vmatpush.msra.mxu2 %v70_v9 }
   0xe   :  { %86 = vmatpush.msra.mxu1 %v69_v10 }
   0xf   :  { %118 = vmatpush.msra.mxu2 %v69_v10 }
  0x10   :  { %87 = vmatpush.msra.mxu1 %v68_v11 }
  0x11   :  { %119 = vmatpush.msra.mxu2 %v68_v11 }
  0x12   :  { %88 = vmatpush.msra.mxu1 %v67_v12 }
  0x13   :  { %120 = vmatpush.msra.mxu2 %v67_v12 }
  0x14   :  { %89 = vmatpush.msra.mxu1 %v66_v13 }
  0x15   :  { %121 = vmatpush.msra.mxu2 %v66_v13 }
  0x16   :  { %90 = vmatpush.msra.mxu1 %v65_v14 }
  0x17   :  { %122 = vmatpush.msra.mxu2 %v65_v14 }
  0x18   :  { %91 = vmatpush.msra.mxu1 %v64_v15 }
  0x19   :  { %123 = vmatpush.msra.mxu2 %v64_v15 }
  0x1a   :  { %92 = vmatpush.msra.mxu1 %v63_v16 }
  0x1b   :  { %124 = vmatpush.msra.mxu2 %v63_v16 }
  0x1c   :  { %93 = vmatpush.msra.mxu1 %v62_v17 }
  0x1d   :  { %125 = vmatpush.msra.mxu2 %v62_v17 }
  0x1e   :  { %94 = vmatpush.msra.mxu1 %v61_v18 }
  0x1f   :  { %126 = vmatpush.msra.mxu2 %v61_v18 }
  0x20   :  { %95 = vmatpush.msra.mxu1 %v60_v19 }
  0x21   :  { %127 = vmatpush.msra.mxu2 %v60_v19 }
  0x82   :  { %v52_v21 = vpop.f32.mrf.mxu0 }
  0x83   :  { %v53_v22 = vadd.f32 %v128_v20, %v52_v21 }
  0x85   :  { %v58_v23 = vmax.f32 %v53_v22, 0.0 }
  0x87   :  { %96 = vmatmul.f32.vlgmr.msra.gmra.mxu1 %v58_v23 }
  0x8a   :  { %v55_v24 = vpop.f32.mrf.mxu0 }
  0x8b   :  { %v56_v25 = vadd.f32 %v128_v20, %v55_v24 }
  0x8d   :  { %v59_v26 = vmax.f32 %v56_v25, 0.0 }
  0x8f   :  { %99 = vmatmul.f32.vlgmr.msra.gmra.mxu2 %v59_v26 }
 0x104   :  { %v97_v28 = vpop.f32.mrf.mxu1 }
 0x105   :  { %v98_v29 = vadd.f32 %v129_v27, %v97_v28 }
 0x107   :  { %104 = vst.msk [vmem:[%s239_s5] sm:$0xff] %vm103_vm1, %v98_v29 }
 0x112   :  { %v100_v30 = vpop.f32.mrf.mxu2 }
 0x113   :  { %v101_v31 = vadd.f32 %v129_v27, %v100_v30 }
 0x115   :  { %105 = vst.msk [vmem:[%s239_s5 + $0x8] sm:$0xff] %vm103_vm1, %v101_v31 }

</bundles_post_ra>
